<compile_context>
chip_gen: v6e
topology: v6e:2x2x1
jax: 0.10.0
libtpu: 0.0.40
codegen_flags: <defaults>
</compile_context>

<pallas_src>
import functools

import jax
import jax.numpy as jnp
from jax import lax
from jax.experimental import pallas as pl
from jax.experimental.pallas import tpu as pltpu


_INV_SQRT2 = 0.7071067811865476


def _erf_approx(x):
    # Abramowitz & Stegun 7.1.26 (|abs err| <= 1.5e-7): only exp / mul / add /
    # div, so it lowers on every TPU generation and the exp lands on the EUP.
    z = jnp.abs(x)
    t = 1.0 / (1.0 + 0.3275911 * z)
    poly = ((((1.061405429 * t - 1.453152027) * t + 1.421413741) * t
             - 0.284496736) * t + 0.254829592) * t
    y = 1.0 - poly * jnp.exp(-z * z)
    return jnp.where(x < 0.0, -y, y)


def _gelu(x):
    # PyTorch nn.GELU() default (exact erf GELU), via the approximation above.
    return 0.5 * x * (1.0 + _erf_approx(x * _INV_SQRT2))


def _layernorm(x, gamma, beta, eps=1e-5):
    mu = jnp.mean(x, axis=-1, keepdims=True)
    var = jnp.mean(jnp.square(x - mu), axis=-1, keepdims=True)
    return (x - mu) * lax.rsqrt(var + eps) * gamma + beta


def _round_up(n, m):
    return ((n + m - 1) // m) * m


def _vmem_budget():
    """(scoped vmem_limit_bytes, per-step slab target) per TPU generation."""
    cap = 128 * 2 ** 20
    try:
        get_info = getattr(pltpu, "get_tpu_info", None)
        if get_info is not None:
            c = getattr(get_info(), "vmem_capacity_bytes", None)
            if c:
                cap = int(c)
    except Exception:
        pass
    # ~48 MiB on v7x (64 MiB physical per TC), ~96 MiB on v5e/v6e (128 MiB).
    limit = int(min(cap * 3 // 4, 96 * 2 ** 20))
    # Bigger slabs amortize per-step overhead on 128 MiB parts; stay small on v7x.
    target = 6 * 2 ** 20 if cap >= 100 * 2 ** 20 else 2 * 2 ** 20
    return limit, target


def _select_bt(B, per_sample_bytes, fits, target_bytes):
    """Samples per grid step: ~target_bytes slab, divisor of B, fits VMEM, and
    prefers >= 4 grid steps (>= 2 per TensorCore on v7x megacore)."""
    bt0 = max(1, min(B, target_bytes // max(1, per_sample_bytes)))
    divisors = [d for d in range(1, B + 1) if B % d == 0]
    for min_steps in (4, 2, 1):
        cands = [d for d in divisors
                 if d <= bt0 and B // d >= min_steps and fits(d)]
        if cands:
            return max(cands)
    return 1


# TODO(synk): patch extraction is pure layout (einops rearrange of a strided
# conv); done with host-side jnp reshape/transpose rather than inside a kernel.
def _extract_patches(x, patch_size):
    """(B, 3, S, S) -> (B, n_patches, 3*ps*ps), row-major patch order.

    Multiplying by the Conv2d weight reshaped to (H, 3*ps*ps) and transposed
    is identical to nn.Conv2d(3, H, kernel_size=ps, stride=ps) followed by
    'n c h w -> n (h w) c'.
    """
    B, C, S, _ = x.shape
    g = S // patch_size
    x = x.reshape(B, C, g, patch_size, g, patch_size)
    x = x.transpose(0, 2, 4, 1, 3, 5)            # (B, gi, gj, C, pu, pv)
    return x.reshape(B, g * g, C * patch_size * patch_size)


def _const_spec(a):
    return pl.BlockSpec(a.shape, lambda i, _nd=a.ndim: (0,) * _nd)


# ----------------------------------------------------------------------------
# MixerBlock kernel
# ----------------------------------------------------------------------------
def mixer_block_kernel(x_ref,
                       g1_ref, be1_ref,          # norm_1 gamma/beta   (1, H) f32
                       tw1_ref, tb1_ref,         # token lin_1 (T, P) bf16, (T, 1) f32
                       tw2_ref, tb2_ref,         # token lin_2 (P, T) bf16, (P, 1) f32
                       g2_ref, be2_ref,          # norm_2 gamma/beta   (1, H) f32
                       cw1t_ref, cb1_ref,        # chan lin_1^T (H, C) bf16, (1, C) f32
                       cw2t_ref, cb2_ref,        # chan lin_2^T (C, H) bf16, (1, H) f32
                       o_ref,
                       xacc_ref):                # VMEM scratch (bt, P, H) f32
    bt, P, H = x_ref.shape
    T = tw1_ref.shape[0]

    g1, be1 = g1_ref[...], be1_ref[...]
    g2, be2 = g2_ref[...], be2_ref[...]
    tw1, tw2 = tw1_ref[...], tw2_ref[...]
    cw1t, cb1 = cw1t_ref[...], cb1_ref[...]
    cw2t, cb2 = cw2t_ref[...], cb2_ref[...]

    # Bias broadcasts hoisted out of the per-sample unroll (no CSE of
    # broadcast_in_dim -> doing this inside the loop would emit bt copies).
    tb1 = jnp.broadcast_to(tb1_ref[...], (T, H))
    tb2 = jnp.broadcast_to(tb2_ref[...], (P, H))

    # ---- token mixing: left-multiplies, H stays on lanes, no transposes ----
    # Each sample's residual result goes straight into the VMEM scratch: no
    # concat/slice relayouts, no growing live ranges across the unroll.
    for b in range(bt):                            # bt is small & static
        xb = x_ref[b].astype(jnp.float32)                               # (P, H)
        yb = _layernorm(xb, g1, be1).astype(jnp.bfloat16)               # (P, H)
        hb = jnp.dot(tw1, yb, preferred_element_type=jnp.float32) + tb1   # (T, H)
        hb = _gelu(hb).astype(jnp.bfloat16)
        xacc_ref[b] = xb + jnp.dot(tw2, hb,
                                   preferred_element_type=jnp.float32) + tb2

    # ---- channel mixing: batch folded into rows for a bigger MXU M ----
    x = xacc_ref[...].reshape(bt * P, H)            # P % 8 == 0 -> tile-aligned
    z = _layernorm(x, g2, be2).astype(jnp.bfloat16)                     # (bt*P, H)
    h2 = jnp.dot(z, cw1t, preferred_element_type=jnp.float32) + cb1     # (bt*P, C)
    h2 = _gelu(h2).astype(jnp.bfloat16)
    out = x + jnp.dot(h2, cw2t, preferred_element_type=jnp.float32) + cb2
    o_ref[...] = out.reshape(bt, P, H).astype(o_ref.dtype)


def mixer_block(x, kp, vmem_limit, target_bytes):
    """x: (B, P, H) f32 (P already padded to a multiple of 8)."""
    B, P, H = x.shape
    T = kp["tw1"].shape[0]
    C = kp["cw1t"].shape[1]

    order = ["g1", "be1", "tw1", "tb1", "tw2", "tb2",
             "g2", "be2", "cw1t", "cb1", "cw2t", "cb2"]
    arrs = [kp[k] for k in order]
    w_bytes = sum(int(a.size) * a.dtype.itemsize for a in arrs)

    def fits(bt):
        slab = bt * P * H * 4                       # f32 activation slab
        interm = bt * (T * H + P * C + 2 * P * H) * 4
        # 2x weights (double-buffered even with constant index maps),
        # 2x (in + out) slabs, scratch, f32 intermediates.
        need = 2 * w_bytes + 4 * slab + slab + interm
        return need <= int(0.85 * vmem_limit)

    bt = _select_bt(B, P * H * 4, fits, target_bytes)
    grid = (B // bt,)

    in_specs = [pl.BlockSpec((bt, P, H), lambda i: (i, 0, 0))] + \
               [_const_spec(a) for a in arrs]

    cost = pl.CostEstimate(
        flops=int(4 * B * P * H * (T + C)),
        transcendentals=int(B * (T * H + P * C)),
        bytes_accessed=int(2 * B * P * H * x.dtype.itemsize + w_bytes))

    return pl.pallas_call(
        mixer_block_kernel,
        out_shape=jax.ShapeDtypeStruct((B, P, H), x.dtype),
        grid_spec=pltpu.PrefetchScalarGridSpec(
            num_scalar_prefetch=0,
            grid=grid,
            in_specs=in_specs,
            out_specs=pl.BlockSpec((bt, P, H), lambda i: (i, 0, 0)),
            scratch_shapes=[pltpu.VMEM((bt, P, H), jnp.float32)]),
        compiler_params=pltpu.CompilerParams(
            dimension_semantics=("parallel",),
            vmem_limit_bytes=vmem_limit),
        cost_estimate=cost,
    )(x, *arrs)


def _prep_block(p, P_pad):
    """PyTorch-layout master params (f32) -> kernel layout (bf16 matmul
    weights, pre-transposed channel weights, patch axis zero-padded to P_pad).
    Zero-padded tw1 columns / tw2 rows / tb2 entries make pad rows contribute
    exactly nothing to real rows."""
    f32, bf16 = jnp.float32, jnp.bfloat16
    P_real = p["tw2"].shape[0]
    pad = P_pad - P_real
    tw1, tw2, tb2 = p["tw1"], p["tw2"], p["tb2"]
    if pad:
        tw1 = jnp.pad(tw1, ((0, 0), (0, pad)))
        tw2 = jnp.pad(tw2, ((0, pad), (0, 0)))
        tb2 = jnp.pad(tb2, ((0, pad),))
    return dict(
        g1=p["g1"].reshape(1, -1).astype(f32),
        be1=p["be1"].reshape(1, -1).astype(f32),
        tw1=tw1.astype(bf16),                      # (T, P_pad) = linear_1.weight
        tb1=p["tb1"].reshape(-1, 1).astype(f32),   # (T, 1)
        tw2=tw2.astype(bf16),                      # (P_pad, T) = linear_2.weight
        tb2=tb2.reshape(-1, 1).astype(f32),        # (P_pad, 1)
        g2=p["g2"].reshape(1, -1).astype(f32),
        be2=p["be2"].reshape(1, -1).astype(f32),
        cw1t=p["cw1"].T.astype(bf16),              # (H, C) pre-transposed
        cb1=p["cb1"].reshape(1, -1).astype(f32),   # (1, C)
        cw2t=p["cw2"].T.astype(bf16),              # (C, H) pre-transposed
        cb2=p["cb2"].reshape(1, -1).astype(f32),   # (1, H)
    )


# ----------------------------------------------------------------------------
# Patch-embedding kernel (per-patch linear == strided conv)
# ----------------------------------------------------------------------------
def _patch_embed_kernel(p_ref, w_ref, b_ref, o_ref):
    bt, P, K = p_ref.shape
    x = p_ref[...].astype(jnp.bfloat16).reshape(bt * P, K)   # P % 8 == 0: aligned
    y = jnp.dot(x, w_ref[...], preferred_element_type=jnp.float32) + b_ref[...]
    o_ref[...] = y.reshape(bt, P, -1).astype(o_ref.dtype)


def _patch_embed(patches, embed_wt_bf16, embed_b, vmem_limit, target_bytes):
    B, P, K = patches.shape
    H = embed_wt_bf16.shape[1]
    w_bytes = int(embed_wt_bf16.size) * 2 + int(embed_b.size) * 4

    def fits(bt):
        need = 2 * w_bytes + 2 * bt * P * (K + H) * 4 + bt * P * (K + H) * 4
        return need <= int(0.85 * vmem_limit)

    bt = _select_bt(B, P * max(K, H) * 4, fits, target_bytes)
    grid = (B // bt,)
    cost = pl.CostEstimate(
        flops=int(2 * B * P * K * H), transcendentals=0,
        bytes_accessed=int(B * P * (K + H) * 4 + w_bytes))
    return pl.pallas_call(
        _patch_embed_kernel,
        out_shape=jax.ShapeDtypeStruct((B, P, H), patches.dtype),
        grid=grid,
        in_specs=[pl.BlockSpec((bt, P, K), lambda i: (i, 0, 0)),
                  _const_spec(embed_wt_bf16),
                  _const_spec(embed_b)],
        out_specs=pl.BlockSpec((bt, P, H), lambda i: (i, 0, 0)),
        compiler_params=pltpu.CompilerParams(
            dimension_semantics=("parallel",),
            vmem_limit_bytes=vmem_limit),
        cost_estimate=cost,
    )(patches, embed_wt_bf16, embed_b)


# ----------------------------------------------------------------------------
# Pre-head norm + masked mean pool + classifier head kernel (batch-gridded)
# ----------------------------------------------------------------------------
def _head_kernel(x_ref, g_ref, b_ref, w_ref, hb_ref, o_ref, *, p_real):
    x = x_ref[...].astype(jnp.float32)                         # (bt, P_pad, H)
    y = _layernorm(x, g_ref[...], b_ref[...])
    P_pad = x.shape[1]
    if p_real == P_pad:
        pooled = jnp.mean(y, axis=1)                           # (bt, H)
    else:
        row = lax.broadcasted_iota(jnp.int32, (1, P_pad, 1), 1)
        mask = (row < p_real).astype(jnp.float32)
        pooled = jnp.sum(y * mask, axis=1) * (1.0 / p_real)    # drop pad rows
    logits = jnp.dot(pooled.astype(jnp.bfloat16), w_ref[...],
                     preferred_element_type=jnp.float32) + hb_ref[...]
    o_ref[...] = logits[:, None, :].astype(o_ref.dtype)


def _head(x, pre_g, pre_b, head_wt_bf16, head_b, p_real, vmem_limit, target_bytes):
    B, P, H = x.shape
    n_classes = head_wt_bf16.shape[1]
    arrs = [pre_g, pre_b, head_wt_bf16, head_b]
    w_bytes = sum(int(a.size) * a.dtype.itemsize for a in arrs)

    def fits(bt):
        need = 2 * w_bytes + 4 * bt * P * H * 4 + 2 * bt * n_classes * 4
        return need <= int(0.85 * vmem_limit)

    bt = _select_bt(B, P * H * 4, fits, target_bytes)
    grid = (B // bt,)
    kernel = functools.partial(_head_kernel, p_real=p_real)
    in_specs = [pl.BlockSpec((bt, P, H), lambda i: (i, 0, 0))] + \
               [_const_spec(a) for a in arrs]
    out = pl.pallas_call(
        kernel,
        out_shape=jax.ShapeDtypeStruct((B, 1, n_classes), jnp.float32),
        grid=grid,
        in_specs=in_specs,
        out_specs=pl.BlockSpec((bt, 1, n_classes), lambda i: (i, 0, 0)),
        compiler_params=pltpu.CompilerParams(
            dimension_semantics=("parallel",),
            vmem_limit_bytes=vmem_limit),
    )(x, *arrs)
    return out.reshape(B, n_classes)


# ----------------------------------------------------------------------------
# Full MlpMixer forward (Pallas) and pure-JAX reference
# ----------------------------------------------------------------------------
def mlp_mixer_forward(x, params, patch_size):
    vmem_limit, target_bytes = _vmem_budget()
    H = int(params["embed_b"].shape[0])

    patches = _extract_patches(x, patch_size)                       # (B, P, K)
    P_real = patches.shape[1]
    P_pad = _round_up(P_real, 8)
    if P_pad != P_real:
        patches = jnp.pad(patches, ((0, 0), (0, P_pad - P_real), (0, 0)))

    embed_wt = params["embed_w"].reshape(H, -1).T.astype(jnp.bfloat16)  # (K, H)
    h = _patch_embed(patches, embed_wt,
                     params["embed_b"].reshape(1, -1).astype(jnp.float32),
                     vmem_limit, target_bytes)

    # TODO(synk): on v5e, carrying inter-block activations in bf16 would halve
    # HBM traffic; kept f32 here to preserve full residual-chain precision.
    for bp in params["blocks"]:
        h = mixer_block(h, _prep_block(bp, P_pad), vmem_limit, target_bytes)

    return _head(h,
                 params["pre_g"].reshape(1, -1).astype(jnp.float32),
                 params["pre_b"].reshape(1, -1).astype(jnp.float32),
                 params["head_w"].T.astype(jnp.bfloat16),
                 params["head_b"].reshape(1, -1).astype(jnp.float32),
                 P_real, vmem_limit, target_bytes)


def mlp_mixer_ref(x, params, patch_size):
    """Pure-JAX f32 reference mirroring the PyTorch forward exactly."""
    def ln(v, g, b):
        mu = jnp.mean(v, axis=-1, keepdims=True)
        var = jnp.mean(jnp.square(v - mu), axis=-1, keepdims=True)
        return (v - mu) * lax.rsqrt(var + 1e-5) * g + b

    def gelu(v):
        return 0.5 * v * (1.0 + lax.erf(v * _INV_SQRT2))

    H = params["embed_b"].shape[0]
    patches = _extract_patches(x, patch_size)
    h = patches @ params["embed_w"].reshape(H, -1).T + params["embed_b"]
    for p in params["blocks"]:
        y = ln(h, p["g1"], p["be1"])
        y = jnp.transpose(y, (0, 2, 1))                              # (B, H, P)
        y = gelu(y @ p["tw1"].T + p["tb1"]) @ p["tw2"].T + p["tb2"]
        y = jnp.transpose(y, (0, 2, 1))
        h = h + y
        y = ln(h, p["g2"], p["be2"])
        h = h + gelu(y @ p["cw1"].T + p["cb1"]) @ p["cw2"].T + p["cb2"]
    y = ln(h, params["pre_g"], params["pre_b"])
    pooled = y.mean(axis=1)
    return pooled @ params["head_w"].T + params["head_b"]


def init_params(key, *, image_size, patch_size, hidden_dim,
                tokens_mlp_dim, channels_mlp_dim, n_classes, n_blocks):
    n_patches = (image_size // patch_size) ** 2
    H, T, C = hidden_dim, tokens_mlp_dim, channels_mlp_dim
    f32 = jnp.float32
    scale = 0.02
    keys = iter(jax.random.split(key, 8 * n_blocks + 4))

    def rnd(shape):
        return scale * jax.random.normal(next(keys), shape, f32)

    blocks = []
    for _ in range(n_blocks):
        blocks.append(dict(
            g1=jnp.ones((H,), f32), be1=jnp.zeros((H,), f32),
            tw1=rnd((T, n_patches)), tb1=rnd((T,)),
            tw2=rnd((n_patches, T)), tb2=rnd((n_patches,)),
            g2=jnp.ones((H,), f32), be2=jnp.zeros((H,), f32),
            cw1=rnd((C, H)), cb1=rnd((C,)),
            cw2=rnd((H, C)), cb2=rnd((H,)),
        ))
    return dict(
        embed_w=rnd((H, 3, patch_size, patch_size)),  # nn.Conv2d weight layout
        embed_b=rnd((H,)),
        blocks=blocks,
        pre_g=jnp.ones((H,), f32), pre_b=jnp.zeros((H,), f32),
        head_w=rnd((n_classes, H)), head_b=rnd((n_classes,)),
    )


if __name__ == "__main__":
    image_size, patch_size = 16, 4            # n_patches = 16
    hidden_dim, tokens_mlp_dim, channels_mlp_dim = 32, 16, 64
    n_classes, n_blocks, batch = 10, 2, 2

    key = jax.random.PRNGKey(0)
    k_x, k_p = jax.random.split(key)
    x = jax.random.normal(k_x, (batch, 3, image_size, image_size), jnp.float32)
    params = init_params(k_p, image_size=image_size, patch_size=patch_size,
                         hidden_dim=hidden_dim, tokens_mlp_dim=tokens_mlp_dim,
                         channels_mlp_dim=channels_mlp_dim,
                         n_classes=n_classes, n_blocks=n_blocks)

    logits = mlp_mixer_forward(x, params, patch_size)
    logits = jax.block_until_ready(logits)

    ref = mlp_mixer_ref(x, params, patch_size)
    assert logits.shape == (batch, n_classes)
    # bf16 MXU operands (f32 accumulation) -> loosened tolerance vs f32 ref.
    max_diff = float(jnp.max(jnp.abs(logits - ref)))
    assert jnp.allclose(logits, ref, rtol=2e-2, atol=2e-2), (
        f"mismatch vs reference, max|diff|={max_diff}")

    print("KERNEL_OK")
</pallas_src>

<mosaic_0001>
module attributes {stable_mosaic.version = 11 : i64} {
  func.func @_patch_embed_kernel(%arg0: i32, %arg1: memref<1x16x48xf32, #tpu.memory_space<vmem>>, %arg2: memref<48x32xbf16, #tpu.memory_space<vmem>>, %arg3: memref<1x32xf32, #tpu.memory_space<vmem>>, %arg4: memref<1x16x32xf32, #tpu.memory_space<vmem>>) attributes {dimension_semantics = [#tpu.dimension_semantics<parallel>], iteration_bounds = array<i64: 2>, scalar_prefetch = 0 : i64, scratch_operands = 0 : i64, tpu.core_type = #tpu.core_type<tc>, window_params = [{transform_indices = @transform_0, window_bounds = array<i64: 1, 16, 48>}, {pipeline_mode = #tpu.pipeline_mode<synchronous>, transform_indices = @transform_1, window_bounds = array<i64: 48, 32>}, {pipeline_mode = #tpu.pipeline_mode<synchronous>, transform_indices = @transform_2, window_bounds = array<i64: 1, 32>}, {transform_indices = @transform_3, window_bounds = array<i64: 1, 16, 32>}]} {
    %c0 = arith.constant 0 : index
    %c0_0 = arith.constant 0 : index
    %c0_1 = arith.constant 0 : index
    %0 = vector.load %arg1[%c0, %c0_0, %c0_1] : memref<1x16x48xf32, #tpu.memory_space<vmem>>, vector<1x16x48xf32>
    %1 = arith.truncf %0 : vector<1x16x48xf32> to vector<1x16x48xbf16>
    %2 = vector.shape_cast %1 : vector<1x16x48xbf16> to vector<16x48xbf16>
    %c0_2 = arith.constant 0 : index
    %c0_3 = arith.constant 0 : index
    %3 = vector.load %arg2[%c0_2, %c0_3] : memref<48x32xbf16, #tpu.memory_space<vmem>>, vector<48x32xbf16>
    %cst = arith.constant dense<0.000000e+00> : vector<16x32xf32>
    %4 = tpu.matmul %2, %3, %cst {dimension_numbers = #tpu.dot_dimension_numbers<[1], [0], [0], [1], [0, 0, 1, 1], [], []>} : vector<16x48xbf16>, vector<48x32xbf16>, vector<16x32xf32> -> vector<16x32xf32>
    %c0_4 = arith.constant 0 : index
    %c0_5 = arith.constant 0 : index
    %5 = vector.load %arg3[%c0_4, %c0_5] : memref<1x32xf32, #tpu.memory_space<vmem>>, vector<1x32xf32>
    %6 = vector.broadcast %5 : vector<1x32xf32> to vector<16x32xf32>
    %7 = arith.addf %4, %6 : vector<16x32xf32>
    %8 = vector.shape_cast %7 : vector<16x32xf32> to vector<1x16x32xf32>
    %c0_6 = arith.constant 0 : index
    %c0_7 = arith.constant 0 : index
    %c0_8 = arith.constant 0 : index
    %9 = vector.load %arg4[%c0_6, %c0_7, %c0_8] : memref<1x16x32xf32, #tpu.memory_space<vmem>>, vector<1x16x32xf32>
    tpu.vector_store %arg4[%c0_6, %c0_7, %c0_8], %8 {strides = array<i32>} : memref<1x16x32xf32, #tpu.memory_space<vmem>>, vector<1x16x32xf32>,
    return
  }
  func.func @transform_0(%arg0: i32) -> (i32, i32, i32) {
    %c0_i32 = arith.constant 0 : i32
    %c0_i32_0 = arith.constant 0 : i32
    %c0_i32_1 = arith.constant 0 : i32
    return %arg0, %c0_i32, %c0_i32_0 : i32, i32, i32
  }
  func.func @transform_1(%arg0: i32) -> (i32, i32) {
    %c0_i32 = arith.constant 0 : i32
    %c0_i32_0 = arith.constant 0 : i32
    %c0_i32_1 = arith.constant 0 : i32
    return %c0_i32, %c0_i32_0 : i32, i32
  }
  func.func @transform_2(%arg0: i32) -> (i32, i32) {
    %c0_i32 = arith.constant 0 : i32
    %c0_i32_0 = arith.constant 0 : i32
    %c0_i32_1 = arith.constant 0 : i32
    return %c0_i32, %c0_i32_0 : i32, i32
  }
  func.func @transform_3(%arg0: i32) -> (i32, i32, i32) {
    %c0_i32 = arith.constant 0 : i32
    %c0_i32_0 = arith.constant 0 : i32
    %c0_i32_1 = arith.constant 0 : i32
    return %arg0, %c0_i32, %c0_i32_0 : i32, i32, i32
  }
}

</mosaic_0001>

<bundles_post_ra>
// kernel: tpu_custom_call.1
= control target key start
LH: loop header
LB: loop body
LE: loop exit
PB: predicated region body
PF: predicated region fallthrough
CT: control target
= control target key end

     0   :  { %8 = vsyncpa [#allocation3], 0  ;;  %s608_s0 = inlined_call_operand.vmem [shape: f32[2,16,48], index: 0, kind: input, shape index: {}]   ;;  %s609_s1 = inlined_call_operand.vmem [shape: bf16[48,32], index: 1, kind: input, shape index: {}]   ;;  %s610_s2 = inlined_call_operand.vmem [shape: f32[1,32], index: 2, kind: input, shape index: {}]   ;;  %s611_s3 = inlined_call_operand.hbm [shape: f32[2,16,32], index: 3, kind: output, shape index: {}]  }
   0x1   :  { %10 = vsyncpa [#allocation3 + $0x1], 0  ;;  %s494_s12 = smov 0   ;;  %s496_s13 = smov 0  }
   0x2   :  { %s498_s14 = smov 0   ;;  %s500_s15 = smov 0  }
   0x3 LB: > { %s515_s16 = sadd.s32 4294967295, %s467_s15   ;;  %s328_s17 = sadd.s32 4294967294, %s467_s15   ;;  %s467_s15 = sphi %s500_s15, %s617_s15   ;;  %s463_s14 = sphi %s498_s14, %s616_s14   ;;  %s459_s13 = sphi %s496_s13, %s615_s13   ;;  %s455_s12 = sphi %s494_s12, %s614_s12  }
   0x4   : > { %s519_s18 = sadd.s32 1, %s467_s15   ;;  %s91_s19 = sadd.s32 1, %s463_s14 }
   0x5   : > { %s88_s20 = ssub.s32 %s467_s15, %s519_s18  ;;  %p101_p0 = scmp.ne.s32.totalorder %s463_s14, %s459_s13 }
   0x6   : > { %p89_p1 = scmp.eq.s32.totalorder %s88_s20, 0  ;;  %p102_p2 = scmp.eq.s32.totalorder %s515_s16, 1 }
   0x7   : > { %p107_p3 = scmp.ne.s32.totalorder %s459_s13, %s455_s12  ;;  %p108_p4 = scmp.eq.s32.totalorder %s328_s17, 1 }
   0x8   : > { %s530_s21 = scalar_select %p89_p1, %s463_s14, %s91_s19  }
   0x9   : > { %p532_p5 = por %p102_p2, %p101_p0  ;;  %p536_p6 = por %p108_p4, %p107_p3 }
   0xa   : > { %p331_p7 = scmp.ge.s32.totalorder %s467_s15, 1  ;;  %p140_p8 = scmp.lt.s32.totalorder %s467_s15, 3 }
   0xc   : > { %p141_p9 = pnand %p331_p7, %p140_p8 }
   0xd   : > { %p164_p10 = scmp.lt.s32.totalorder (!%p141_p9), %s515_s16, 1  ;;  %s161_s8 = sand.u32 (!%p141_p9), 1, %s459_s13  }
   0xe   : > { %144 = sbr.rel (%p141_p9) target bundleno = 245 (0xf5), region = 32  ;;  %s332_s9 = sshll.u32 (!%p141_p9), %s161_s8, 4 }
   0xf   : > { %s163_s17 = scalar_lea.vmem (!%p141_p9), [#allocation2], %s332_s9  ;;  %s346_s20 = sshll.u32 (!%p141_p9), %s515_s16, 8 }
  0x10   : > { %s266_s19 = sshll.u32 (!%p141_p9), %s163_s17, 4  ;;  %s566_s26 = scalar_lea.hbm (!%p141_p9), %s611_s3, %s346_s20  ;;  %s561_s19 = int_to_ptr.vmem [resolvable:$true] %s266_s19 }
  0x11   : > { %s568_s27 = scalar_lea.sflag (!%p141_p9), [#allocation3], %s161_s8 }
  0x13   : > { %v404_v0 = vld [vmem:[%s609_s1 + $0x10] sm:$0xff]   ;;  %v469_v1 = vmov 0.0   ;;  %v405_v2 = vld [vmem:[%s609_s1 + $0x8] sm:$0xff]   ;;  %vm470_vm0 = vmmov 0   ;;  %s165_s28 = scalar_select %p164_p10, %s515_s16, 1  ;;  %v406_v3 = vld [vmem:[%s609_s1] sm:$0xff]  }
  0x14   : > { %351 = vmatprep.subr.bf16.mxu0 %v469_v1  ;;  %357 = vmatprep.mubr.msk.bf16.mxu0 %vm470_vm0, %v469_v1  ;;  %vm204_vm1 = vcmask 392192   ;;  %v335_v7 = vld [vmem:[%s610_s2] ss:$0 sm:$0xff]  ;;  %vm249_vm2 = vcmask 261120   ;;  %s471_s16 = smov [#allocation2]  }
  0x15   : > { %352 = vmatpush3.bf16.msra.mxu0 %v404_v0  ;;  %s345_s4 = sshll.u32 %s165_s28, 4  ;;  %s407_s28 = scalar_lea.vmem %s561_s19, 256 }
  0x16   : > { %353 = vmatprep.subr.bf16.mxu0 %v469_v1  ;;  %s168_s7 = scalar_lea.vmem %s608_s0, %s345_s4  ;;  %p408_p11 = scmp.ne.s32.totalorder %s561_s19, %s407_s28 }
  0x17   : > { %v170_v4 = vld [vmem:[%s168_s7] sm:$0xff]  ;;  %v171_v5 = vld [vmem:[%s168_s7 + $0x8] sm:$0xff]  ;;  %s411_s29 = sshll.u32 %s471_s16, 4  ;;  %s412_s29 = int_to_ptr.vmem [resolvable:$false] %s411_s29 }
  0x18   : > { %v172_v6 = vpack.c.bf16 %v171_v5, %v170_v4  ;;  %p409_p12 = pnand %p408_p11, %p532_p5  ;;  %s413_s30 = scalar_lea.vmem %s412_s29, 512 }
  0x19   : > { %354 = vmatpush3.bf16.msra.mxu0 %v405_v2  ;;  %p414_p0 = scmp.lt.s32.totalorder %s561_s19, %s412_s29  ;;  %p415_p1 = scmp.lt.s32.totalorder %s413_s30, %s407_s28 }
  0x1a   : > { %355 = vmatprep.subr.bf16.mxu0 %v469_v1  ;;  %p410_p13 = pneg %p409_p12 }
  0x1b   : > { %p416_p2 = por %p415_p1, %p414_p0 }
  0x1d   : > { %356 = vmatpush3.bf16.msra.mxu0 %v406_v3  ;;  %p417_p3 = pnand %p416_p2, %p410_p13 }
  0x20   : > { %358 = vmatmul.mubr.msk.bf16.vlgmr.msra.gmra.mxu0 %vm204_vm1, %v172_v6 }
  0xe0   : > { %v242_v8 = vpop.f32.mrf.mxu0 }
  0xe1   : > { %v243_v9 = vadd.f32 %v335_v7, %v242_v8 }
  0xe2   : > { %v359_v10 = vpop.f32.mrf.mxu0 }
  0xe3   : > { %250 = vst.msk [vmem:[%s163_s17] sm:$0xff] %vm249_vm2, %v243_v9 }
  0xe4   : > { %v245_v11 = vpop.f32.mrf.mxu0 }
  0xe5   : > { %v246_v12 = vadd.f32 %v335_v7, %v245_v11 }
  0xe6   : > { %v360_v13 = vpop.f32.mrf.mxu0 }
  0xe7   : > { %251 = vst.msk [vmem:[%s163_s17 + $0x8] sm:$0xff] %vm249_vm2, %v246_v12 }
  0xe8   : > { %420 = shalt.err (!%p417_p3)
}
  0xe9   : > { %s421_s4 = scalar_lea.hbm %s566_s26, 256  ;;  %s425_s7 = scalar_lea.hbm %s611_s3, 512 }
  0xea   : > { %p422_p4 = scmp.ne.s32.totalorder %s566_s26, %s421_s4  ;;  %p426_p9 = scmp.lt.s32.totalorder %s566_s26, %s611_s3 }
  0xeb   : > { %p427_p10 = scmp.lt.s32.totalorder %s425_s7, %s421_s4 }
  0xec   : > { %p423_p7 = pnand %p422_p4, %p532_p5 }
  0xed   : > { %p428_p11 = por %p427_p10, %p426_p9 }
  0xee   : > { %p424_p8 = pneg %p423_p7 }
  0xf0   : > { %p429_p12 = pnand %p428_p11, %p424_p8 }
  0xf2   : > { %432 = shalt.err (!%p429_p12)
}
  0xf3   : > { %s472_s10 = smov 128   ;;  %s473_s11 = smov 8  }
  0xf4   : > { %361 = dma.vmem_to_hbm [thread:$0]  (%p532_p5), %s561_s19, 256, %s566_s26, %s568_s27, %s472_s10, %s472_s10, %s473_s11  }
  0xf5 PF: > { %p367_p13 = scmp.ge.s32.totalorder %s467_s15, 2  ;;  %s281_s17 = sand.u32 1, %s455_s12  }
  0xf6   : > { %s282_s20 = scalar_lea.sflag [#allocation3], %s281_s17 }
  0xf7   : > { %p364_p0 = pnand %p367_p13, %p536_p6 }
  0xf9   : > { %p365_p1 = pneg %p364_p0 }
  0xfb   : > { %450 = dma.done.wait (%p365_p1), %s282_s20, 256  }
  0xfc   : > { %452 = vsyncadd (%p365_p1), %s282_s20, 4294967040  ;;  %p13_p2 = scmp.ge.s32.totalorder %s519_s18, 4   ;;  %s614_s12 = smov %s459_s13 }
  0xfd   : > { %s615_s13 = smov %s463_s14  ;;  %s616_s14 = smov %s530_s21 }
  0xfe   : > { %s617_s15 = smov %s519_s18  ;;  %15 = sbr.rel (!%p13_p2) target bundleno = 3 (0x3), region = 67 }
 0x103   :  { %287 = vsyncpa [#allocation3], 1 }
 0x104   :  { %289 = vsyncpa [#allocation3 + $0x1], 1 }

</bundles_post_ra>
